<compile_context>
chip_gen: v5e
topology: v5e:2x2
jax: 0.10.0
libtpu: 0.0.40
codegen_flags: <defaults>
</compile_context>

<pallas_src>
import functools

import numpy as np
import jax
import jax.numpy as jnp
from jax import lax
from jax.experimental import pallas as pl
from jax.experimental.pallas import tpu as pltpu

HIDDEN = 512


def _round_up(x, m):
    return (x + m - 1) // m * m


def _mix32(z):
    """murmur3-style 32-bit finalizer (wraparound uint32 arithmetic)."""
    z = z ^ (z >> 16)
    z = z * jnp.uint32(0x85EBCA6B)
    z = z ^ (z >> 13)
    z = z * jnp.uint32(0xC2B2AE35)
    z = z ^ (z >> 16)
    return z


def _classifier_kernel(block_m, keep_thresh, inv_keep, apply_dropout,
                       seed_ref,                                  # scalar prefetch (SMEM)
                       x_ref, w1_ref, b1_ref, w2_ref, b2_ref,     # inputs (VMEM)
                       o_ref):                                    # output (VMEM)
    # ---- fc1: x @ W1 + b1, ReLU (MXU in input dtype, f32 accumulate) -------
    h = jnp.dot(x_ref[...], w1_ref[...], preferred_element_type=jnp.float32)
    h = jnp.maximum(h + b1_ref[...], 0.0)          # b1 (1, HIDDEN) broadcasts

    # ---- dropout: mask + 1/(1-p) scale (training-mode semantics) -----------
    if apply_dropout:
        pid = pl.program_id(0)
        row0 = (pid * block_m).astype(jnp.uint32)  # global row offset of tile
        seed = seed_ref[0].astype(jnp.uint32)
        rows = lax.broadcasted_iota(jnp.uint32, h.shape, 0) + row0
        cols = lax.broadcasted_iota(jnp.uint32, h.shape, 1)
        ctr = rows * jnp.uint32(h.shape[1]) + cols
        z = _mix32(ctr ^ (seed * jnp.uint32(0x9E3779B9)) ^ jnp.uint32(0x243F6A88))
        keep = z >= jnp.uint32(keep_thresh)        # P(keep) = 1 - p
        h = jnp.where(keep, h * inv_keep, 0.0)

    # ---- fc2: h @ W2 + b2 ----------------------------------------------------
    out = jnp.dot(h.astype(w2_ref.dtype), w2_ref[...],
                  preferred_element_type=jnp.float32)
    o_ref[...] = (out + b2_ref[...]).astype(o_ref.dtype)


def classifier_forward(x, params, *, dropout=0.5, training=True, seed=0,
                       use_bf16=True, block_m=None):
    """Fused MLP classifier forward pass in a single Pallas kernel.

    x: (B, in_features) float32
    params: dict with w1 (in,512), b1 (512,), w2 (512,out), b2 (out,)
    """
    w1, b1, w2, b2 = params["w1"], params["b1"], params["w2"], params["b2"]
    B, in_features = x.shape
    hidden = w1.shape[1]
    out_features = w2.shape[1]
    out_dtype = x.dtype

    # ---- lane-dense output padding (multiple of 128) ------------------------
    n_pad = max(_round_up(out_features, 128), 128)
    if n_pad != out_features:
        w2 = jnp.pad(w2, ((0, 0), (0, n_pad - out_features)))
        b2 = jnp.pad(b2, (0, n_pad - out_features))

    # ---- batch tiling --------------------------------------------------------
    if block_m is None:
        block_m = min(512, _round_up(B, 8))
    b_pad = _round_up(B, block_m)
    if b_pad != B:
        x = jnp.pad(x, ((0, b_pad - B), (0, 0)))
    grid = (b_pad // block_m,)

    # ---- dtypes: bf16 MXU inputs, f32 bias/accumulate ------------------------
    compute_dtype = jnp.bfloat16 if use_bf16 else jnp.float32
    x_in = x.astype(compute_dtype)
    w1_in = w1.astype(compute_dtype)
    w2_in = w2.astype(compute_dtype)
    b1_2d = b1.reshape(1, hidden).astype(jnp.float32)
    b2_2d = b2.reshape(1, n_pad).astype(jnp.float32)
    seed_arr = jnp.asarray([seed], dtype=jnp.int32)

    apply_dropout = bool(training) and dropout > 0.0
    keep_thresh = min(int(dropout * (1 << 32)), (1 << 32) - 1)
    inv_keep = float(1.0 / (1.0 - dropout)) if (apply_dropout and dropout < 1.0) else 0.0

    kernel = functools.partial(_classifier_kernel, block_m, keep_thresh,
                               inv_keep, apply_dropout)

    # VMEM budget: double-buffered x/out tiles + resident weights + headroom.
    itemsize = 2 if use_bf16 else 4
    est = (2 * block_m * in_features * itemsize
           + 2 * in_features * hidden * itemsize
           + 2 * hidden * n_pad * itemsize
           + 2 * block_m * n_pad * 4
           + 4 * block_m * hidden * 4)
    vmem_limit = int(min(max(2 * est, 32 << 20), 64 << 20))

    grid_spec = pltpu.PrefetchScalarGridSpec(
        num_scalar_prefetch=1,
        grid=grid,
        in_specs=[
            # activations: tiled over the batch grid axis
            pl.BlockSpec((block_m, in_features), lambda i, seed: (i, 0)),
            # weights / biases: constant index_map -> VMEM-resident across steps
            pl.BlockSpec((in_features, hidden), lambda i, seed: (0, 0)),
            pl.BlockSpec((1, hidden), lambda i, seed: (0, 0)),
            pl.BlockSpec((hidden, n_pad), lambda i, seed: (0, 0)),
            pl.BlockSpec((1, n_pad), lambda i, seed: (0, 0)),
        ],
        out_specs=pl.BlockSpec((block_m, n_pad), lambda i, seed: (i, 0)),
    )

    out = pl.pallas_call(
        kernel,
        out_shape=jax.ShapeDtypeStruct((b_pad, n_pad), jnp.float32),
        grid_spec=grid_spec,
        compiler_params=pltpu.CompilerParams(
            dimension_semantics=("parallel",),
            vmem_limit_bytes=vmem_limit),
    )(seed_arr, x_in, w1_in, b1_2d, w2_in, b2_2d)

    return out[:B, :out_features].astype(out_dtype)


def init_params(key, in_features, out_features):
    """Deterministic init mirroring nn.Linear's default (uniform +-1/sqrt(fan_in)).

    Weights are stored transposed relative to PyTorch: (in, out).
    """
    k1, k2, k3, k4 = jax.random.split(key, 4)
    bound1 = 1.0 / np.sqrt(in_features)
    bound2 = 1.0 / np.sqrt(HIDDEN)
    return {
        "w1": jax.random.uniform(k1, (in_features, HIDDEN), jnp.float32,
                                 -bound1, bound1),
        "b1": jax.random.uniform(k2, (HIDDEN,), jnp.float32, -bound1, bound1),
        "w2": jax.random.uniform(k3, (HIDDEN, out_features), jnp.float32,
                                 -bound2, bound2),
        "b2": jax.random.uniform(k4, (out_features,), jnp.float32,
                                 -bound2, bound2),
    }


if __name__ == "__main__":
    B, IN_FEATURES, OUT_FEATURES = 8, 32, 16

    key = jax.random.PRNGKey(0)
    k_params, k_x = jax.random.split(key)
    params = init_params(k_params, IN_FEATURES, OUT_FEATURES)
    x = jax.random.normal(k_x, (B, IN_FEATURES), dtype=jnp.float32)

    # Training-mode forward (dropout active, deterministic seed).
    out_train = classifier_forward(x, params, dropout=0.5, training=True,
                                   seed=1234)
    jax.block_until_ready(out_train)
    assert out_train.shape == (B, OUT_FEATURES)
    assert bool(jnp.all(jnp.isfinite(out_train)))

    # Eval-mode forward (dropout is identity) — check against a pure-JAX
    # reference that mirrors the kernel's bf16-MXU / f32-accumulate math.
    out_eval = classifier_forward(x, params, dropout=0.5, training=False)
    jax.block_until_ready(out_eval)

    xb = x.astype(jnp.bfloat16)
    w1b = params["w1"].astype(jnp.bfloat16)
    w2b = params["w2"].astype(jnp.bfloat16)
    h_ref = jnp.maximum(
        jnp.dot(xb, w1b, preferred_element_type=jnp.float32) + params["b1"], 0.0)
    ref = (jnp.dot(h_ref.astype(jnp.bfloat16), w2b,
                   preferred_element_type=jnp.float32) + params["b2"])
    np.testing.assert_allclose(np.asarray(out_eval), np.asarray(ref),
                               rtol=2e-2, atol=2e-2)

    print("KERNEL_OK")
</pallas_src>

<mosaic_0001>
module attributes {stable_mosaic.version = 11 : i64} {
  func.func @_classifier_kernel(%arg0: i32, %arg1: memref<1xi32, #tpu.memory_space<smem>>, %arg2: memref<8x32xbf16, #tpu.memory_space<vmem>>, %arg3: memref<32x512xbf16, #tpu.memory_space<vmem>>, %arg4: memref<1x512xf32, #tpu.memory_space<vmem>>, %arg5: memref<512x128xbf16, #tpu.memory_space<vmem>>, %arg6: memref<1x128xf32, #tpu.memory_space<vmem>>, %arg7: memref<8x128xf32, #tpu.memory_space<vmem>>) attributes {dimension_semantics = [#tpu.dimension_semantics<parallel>], iteration_bounds = array<i64: 1>, scalar_prefetch = 1 : i64, scratch_operands = 0 : i64, tpu.core_type = #tpu.core_type<tc>, window_params = [{transform_indices = @transform_0, window_bounds = array<i64: 8, 32>}, {pipeline_mode = #tpu.pipeline_mode<synchronous>, transform_indices = @transform_1, window_bounds = array<i64: 32, 512>}, {pipeline_mode = #tpu.pipeline_mode<synchronous>, transform_indices = @transform_2, window_bounds = array<i64: 1, 512>}, {pipeline_mode = #tpu.pipeline_mode<synchronous>, transform_indices = @transform_3, window_bounds = array<i64: 512, 128>}, {pipeline_mode = #tpu.pipeline_mode<synchronous>, transform_indices = @transform_4, window_bounds = array<i64: 1, 128>}, {transform_indices = @transform_5, window_bounds = array<i64: 8, 128>}]} {
    %c0 = arith.constant 0 : index
    %c0_0 = arith.constant 0 : index
    %0 = vector.load %arg2[%c0, %c0_0] : memref<8x32xbf16, #tpu.memory_space<vmem>>, vector<8x32xbf16>
    %c0_1 = arith.constant 0 : index
    %c0_2 = arith.constant 0 : index
    %1 = vector.load %arg3[%c0_1, %c0_2] : memref<32x512xbf16, #tpu.memory_space<vmem>>, vector<32x512xbf16>
    %cst = arith.constant dense<0.000000e+00> : vector<8x512xf32>
    %2 = tpu.matmul %0, %1, %cst {dimension_numbers = #tpu.dot_dimension_numbers<[1], [0], [0], [1], [0, 0, 1, 1], [], []>} : vector<8x32xbf16>, vector<32x512xbf16>, vector<8x512xf32> -> vector<8x512xf32>
    %c0_3 = arith.constant 0 : index
    %c0_4 = arith.constant 0 : index
    %3 = vector.load %arg4[%c0_3, %c0_4] : memref<1x512xf32, #tpu.memory_space<vmem>>, vector<1x512xf32>
    %4 = vector.broadcast %3 : vector<1x512xf32> to vector<8x512xf32>
    %5 = arith.addf %2, %4 : vector<8x512xf32>
    %cst_5 = arith.constant 0.000000e+00 : f32
    %6 = vector.broadcast %cst_5 : f32 to vector<8x512xf32>
    %7 = arith.maximumf %5, %6 : vector<8x512xf32>
    %c8_i32 = arith.constant 8 : i32
    %8 = arith.muli %arg0, %c8_i32 : i32
    %c0_6 = arith.constant 0 : index
    %9 = memref.load %arg1[%c0_6] : memref<1xi32, #tpu.memory_space<smem>>
    %10 = tpu.iota {dimensions = array<i32: 0>} : vector<8x512xi32>
    %11 = vector.broadcast %8 : i32 to vector<8x512xi32>
    %12 = arith.addi %10, %11 : vector<8x512xi32>
    %13 = tpu.iota {dimensions = array<i32: 1>} : vector<8x512xi32>
    %c512_i32 = arith.constant 512 : i32
    %14 = vector.broadcast %c512_i32 : i32 to vector<8x512xi32>
    %15 = arith.muli %12, %14 : vector<8x512xi32>
    %16 = arith.addi %15, %13 : vector<8x512xi32>
    %c-1640531527_i32 = arith.constant -1640531527 : i32
    %17 = arith.muli %9, %c-1640531527_i32 : i32
    %18 = vector.broadcast %17 : i32 to vector<8x512xi32>
    %19 = arith.xori %16, %18 : vector<8x512xi32>
    %c608135816_i32 = arith.constant 608135816 : i32
    %20 = vector.broadcast %c608135816_i32 : i32 to vector<8x512xi32>
    %21 = arith.xori %19, %20 : vector<8x512xi32>
    %c16_i32 = arith.constant 16 : i32
    %22 = vector.broadcast %c16_i32 : i32 to vector<8x512xi32>
    %23 = arith.shrui %21, %22 : vector<8x512xi32>
    %24 = arith.xori %21, %23 : vector<8x512xi32>
    %c-2048144789_i32 = arith.constant -2048144789 : i32
    %25 = vector.broadcast %c-2048144789_i32 : i32 to vector<8x512xi32>
    %26 = arith.muli %24, %25 : vector<8x512xi32>
    %c13_i32 = arith.constant 13 : i32
    %27 = vector.broadcast %c13_i32 : i32 to vector<8x512xi32>
    %28 = arith.shrui %26, %27 : vector<8x512xi32>
    %29 = arith.xori %26, %28 : vector<8x512xi32>
    %c-1028477387_i32 = arith.constant -1028477387 : i32
    %30 = vector.broadcast %c-1028477387_i32 : i32 to vector<8x512xi32>
    %31 = arith.muli %29, %30 : vector<8x512xi32>
    %c16_i32_7 = arith.constant 16 : i32
    %32 = vector.broadcast %c16_i32_7 : i32 to vector<8x512xi32>
    %33 = arith.shrui %31, %32 : vector<8x512xi32>
    %34 = arith.xori %31, %33 : vector<8x512xi32>
    %c-2147483648_i32 = arith.constant -2147483648 : i32
    %35 = vector.broadcast %c-2147483648_i32 : i32 to vector<8x512xi32>
    %36 = arith.cmpi uge, %34, %35 : vector<8x512xi32>
    %cst_8 = arith.constant 2.000000e+00 : f32
    %37 = vector.broadcast %cst_8 : f32 to vector<8x512xf32>
    %38 = arith.mulf %7, %37 : vector<8x512xf32>
    %cst_9 = arith.constant 0.000000e+00 : f32
    %39 = vector.broadcast %cst_9 : f32 to vector<8x512xf32>
    %40 = arith.select %36, %38, %39 : vector<8x512xi1>, vector<8x512xf32>
    %41 = arith.truncf %40 : vector<8x512xf32> to vector<8x512xbf16>
    %c0_10 = arith.constant 0 : index
    %c0_11 = arith.constant 0 : index
    %42 = vector.load %arg5[%c0_10, %c0_11] : memref<512x128xbf16, #tpu.memory_space<vmem>>, vector<512x128xbf16>
    %cst_12 = arith.constant dense<0.000000e+00> : vector<8x128xf32>
    %43 = tpu.matmul %41, %42, %cst_12 {dimension_numbers = #tpu.dot_dimension_numbers<[1], [0], [0], [1], [0, 0, 1, 1], [], []>} : vector<8x512xbf16>, vector<512x128xbf16>, vector<8x128xf32> -> vector<8x128xf32>
    %c0_13 = arith.constant 0 : index
    %c0_14 = arith.constant 0 : index
    %44 = vector.load %arg6[%c0_13, %c0_14] : memref<1x128xf32, #tpu.memory_space<vmem>>, vector<1x128xf32>
    %45 = vector.broadcast %44 : vector<1x128xf32> to vector<8x128xf32>
    %46 = arith.addf %43, %45 : vector<8x128xf32>
    %c0_15 = arith.constant 0 : index
    %c0_16 = arith.constant 0 : index
    %47 = vector.load %arg7[%c0_15, %c0_16] : memref<8x128xf32, #tpu.memory_space<vmem>>, vector<8x128xf32>
    tpu.vector_store %arg7[%c0_15, %c0_16], %46 {strides = array<i32>} : memref<8x128xf32, #tpu.memory_space<vmem>>, vector<8x128xf32>,
    return
  }
  func.func @transform_0(%arg0: i32, %arg1: memref<1xi32, #tpu.memory_space<smem>>) -> (i32, i32) {
    %c0_i32 = arith.constant 0 : i32
    %c0_i32_0 = arith.constant 0 : i32
    return %arg0, %c0_i32 : i32, i32
  }
  func.func @transform_1(%arg0: i32, %arg1: memref<1xi32, #tpu.memory_space<smem>>) -> (i32, i32) {
    %c0_i32 = arith.constant 0 : i32
    %c0_i32_0 = arith.constant 0 : i32
    %c0_i32_1 = arith.constant 0 : i32
    return %c0_i32, %c0_i32_0 : i32, i32
  }
  func.func @transform_2(%arg0: i32, %arg1: memref<1xi32, #tpu.memory_space<smem>>) -> (i32, i32) {
    %c0_i32 = arith.constant 0 : i32
    %c0_i32_0 = arith.constant 0 : i32
    %c0_i32_1 = arith.constant 0 : i32
    return %c0_i32, %c0_i32_0 : i32, i32
  }
  func.func @transform_3(%arg0: i32, %arg1: memref<1xi32, #tpu.memory_space<smem>>) -> (i32, i32) {
    %c0_i32 = arith.constant 0 : i32
    %c0_i32_0 = arith.constant 0 : i32
    %c0_i32_1 = arith.constant 0 : i32
    return %c0_i32, %c0_i32_0 : i32, i32
  }
  func.func @transform_4(%arg0: i32, %arg1: memref<1xi32, #tpu.memory_space<smem>>) -> (i32, i32) {
    %c0_i32 = arith.constant 0 : i32
    %c0_i32_0 = arith.constant 0 : i32
    %c0_i32_1 = arith.constant 0 : i32
    return %c0_i32, %c0_i32_0 : i32, i32
  }
  func.func @transform_5(%arg0: i32, %arg1: memref<1xi32, #tpu.memory_space<smem>>) -> (i32, i32) {
    %c0_i32 = arith.constant 0 : i32
    %c0_i32_0 = arith.constant 0 : i32
    return %arg0, %c0_i32 : i32, i32
  }
}

</mosaic_0001>

<bundles_post_ra>
// kernel: tpu_custom_call.1
= control target key start
LH: loop header
LB: loop body
LE: loop exit
PB: predicated region body
PF: predicated region fallthrough
CT: control target
= control target key end

     0   :  { %12 = vsyncpa [#allocation5], 0  ;;  %s1053_s0 = inlined_call_operand.<no memory space> [shape: s32[1], index: 0, kind: input, shape index: {}]   ;;  %s1054_s1 = inlined_call_operand.hbm [shape: bf16[8,32], index: 1, kind: input, shape index: {}]   ;;  %s1055_s2 = inlined_call_operand.hbm [shape: bf16[32,512], index: 2, kind: input, shape index: {}]   ;;  %s1056_s3 = inlined_call_operand.hbm [shape: f32[1,512], index: 3, kind: input, shape index: {}]   ;;  %s1057_s4 = inlined_call_operand.hbm [shape: bf16[512,128], index: 4, kind: input, shape index: {}]   ;;  %s1058_s5 = inlined_call_operand.vmem [shape: f32[1,128], index: 5, kind: input, shape index: {}]   ;;  %s1059_s6 = inlined_call_operand.hbm [shape: f32[8,128], index: 6, kind: output, shape index: {}]  }
   0x1   :  { %13 = vsyncpa [#allocation8], 0 }
   0x2   :  { %14 = vsyncpa [#allocation11], 0  ;;  %s31_s23 = sshll.u32 %s1055_s2, 4  ;;  %s32_s23 = int_to_ptr.hbm [resolvable:$true] %s31_s23 }
   0x3   :  { %15 = vsyncpa [#allocation6], 0  ;;  %s974_s24 = smov [#allocation7]   ;;  %s21_s28 = sshll.u32 %s1054_s1, 4  ;;  %s22_s28 = int_to_ptr.hbm [resolvable:$true] %s21_s28 }
   0x4   :  { %s33_s25 = sshll.u32 %s974_s24, 4  ;;  %s975_s29 = smov 256   ;;  %s34_s25 = int_to_ptr.vmem [resolvable:$true] %s33_s25 }
   0x5   :  { %s976_s30 = smov 16   ;;  %s977_s7 = smov [#allocation4]  }
   0x6   :  { %39 = dma.hbm_to_vmem [thread:$0]  %s32_s23, 1024, %s34_s25, [#allocation8], %s975_s29, %s975_s29, %s976_s30  }
   0x7   :  { %s23_s8 = sshll.u32 %s977_s7, 4  ;;  %s45_s11 = sshll.u32 %s1056_s3, 4  ;;  %s24_s8 = int_to_ptr.vmem [resolvable:$true] %s23_s8  ;;  %s46_s11 = int_to_ptr.hbm [resolvable:$true] %s45_s11 }
   0x8   :  { %26 = dma.hbm_to_vmem [thread:$0]  %s22_s28, 64, %s24_s8, [#allocation5]  }
   0x9   :  { %s55_s13 = sshll.u32 %s1057_s4, 4  ;;  %s978_s14 = smov [#allocation9]   ;;  %s56_s13 = int_to_ptr.hbm [resolvable:$true] %s55_s13 }
   0xa   :  { %s47_s15 = sshll.u32 %s978_s14, 4  ;;  %s979_s1 = smov [#allocation10]   ;;  %s48_s15 = int_to_ptr.vmem [resolvable:$true] %s47_s15 }
   0xb   :  { %50 = dma.hbm_to_vmem [thread:$0]  %s46_s11, 64, %s48_s15, [#allocation8]  }
   0xc   :  { %s57_s16 = sshll.u32 %s979_s1, 4  ;;  %s980_s17 = smov 64   ;;  %s58_s16 = int_to_ptr.vmem [resolvable:$true] %s57_s16 }
   0xd   :  { %s981_s18 = smov 4  }
   0xe   :  { %63 = dma.hbm_to_vmem [thread:$0]  %s56_s13, 4096, %s58_s16, [#allocation11], %s980_s17, %s980_s17, %s981_s18  }
   0xf   :  { %966 = dma.done.wait [#allocation5], 64  }
  0x10   :  { %967 = vsyncadd [#allocation5], 4294967232 }
  0x11   :  { %968 = dma.done.wait [#allocation8], 1088  }
  0x12   :  { %969 = vsyncadd [#allocation8], 4294966208 }
  0x13   :  { %970 = dma.done.wait [#allocation11], 4096  }
  0x14   :  { %971 = vsyncadd [#allocation11], 4294963200  ;;  %v642_v0 = vld [vmem:[#allocation7 + $0x28] sm:$0xf]  ;;  %v803_v1 = vld [vmem:[#allocation7 + $0x34] sm:$0xf0]  ;;  %v204_v46 = vlaneseq }
  0x15   :  { %v801_v2 = vld [vmem:[#allocation7 + $0x2c] sm:$0xf]  ;;  %v643_v3 = vor.u32 %v803_v1, %v642_v0  ;;  %v644_v4 = vld [vmem:[#allocation7 + $0x38] sm:$0xf0]  ;;  %v634_v5 = vld [vmem:[#allocation7 + $0x20] sm:$0xf] }
  0x16   :  { %v802_v6 = vld [vmem:[#allocation7 + $0x2c] sm:$0xf0]  ;;  %v647_v7 = vor.u32 %v801_v2, %v644_v4  ;;  %v800_v9 = vld [vmem:[#allocation7 + $0x24] sm:$0xf]  ;;  %v636_v10 = vld [vmem:[#allocation7 + $0x30] sm:$0xf0] }
  0x17   :  { %v635_v8 = vor.u32 %v802_v6, %v634_v5  ;;  %v626_v11 = vld [vmem:[#allocation7 + $0x8] sm:$0xf]  ;;  %178 = vmatpush.bf16.msra.mxu2 %v643_v3  ;;  %v639_v12 = vor.u32 %v800_v9, %v636_v10  ;;  %v799_v13 = vld [vmem:[#allocation7 + $0x14] sm:$0xf0]  ;;  %v797_v14 = vld [vmem:[#allocation7 + $0xc] sm:$0xf] }
  0x18   :  { %v628_v15 = vld [vmem:[#allocation7 + $0x18] sm:$0xf0]  ;;  %191 = vmatpush.bf16.msra.mxu3 %v647_v7  ;;  %v627_v16 = vor.u32 %v799_v13, %v626_v11  ;;  %v618_v18 = vld [vmem:[#allocation7] sm:$0xf]  ;;  %v798_v19 = vld [vmem:[#allocation7 + $0xc] sm:$0xf0] }
  0x19   :  { %152 = vmatpush.bf16.msra.mxu0 %v635_v8  ;;  %v631_v17 = vor.u32 %v797_v14, %v628_v15  ;;  %165 = vmatpush.bf16.msra.mxu1 %v639_v12  ;;  %v619_v20 = vor.u32 %v798_v19, %v618_v18  ;;  %v796_v21 = vld [vmem:[#allocation7 + $0x4] sm:$0xf]  ;;  %v620_v22 = vld [vmem:[#allocation7 + $0x10] sm:$0xf0]  ;;  %v811_v23 = vld [vmem:[#allocation10 + $0x38] sm:$0xff]  ;;  %vm142_vm0 = vcmask 261120  }
  0x1a   :  { %v623_v24 = vor.u32 %v796_v21, %v620_v22  ;;  %v819_v25 = vld [vmem:[#allocation10 + $0x78] sm:$0xff]  ;;  %v810_v28 = vld [vmem:[#allocation10 + $0x30] sm:$0xff]  ;;  %v809_v32 = vld [vmem:[#allocation10 + $0x28] sm:$0xff]  ;;  %v205_v47 = vshrl.u32 %v204_v46, 7  ;;  %v209_v48 = vand.u32 127, %v204_v46  ;;  %s982_s21 = smov [#allocation12]  }
  0x1b   :  { %179 = vmatpush.bf16.msra.mxu2 %v627_v16  ;;  %v83_v26 = vld [vmem:[#allocation4] sm:$0xf]  ;;  %v818_v30 = vld [vmem:[#allocation10 + $0x70] sm:$0xff]  ;;  %v817_v34 = vld [vmem:[#allocation10 + $0x68] sm:$0xff]  ;;  %s218_s19 = smul.u32 2654435769, %s1053_s0 }
  0x1c   :  { %192 = vmatpush.bf16.msra.mxu3 %v631_v17  ;;  %v827_v27 = vld [vmem:[#allocation10 + $0xb8] sm:$0xff]  ;;  %v826_v31 = vld [vmem:[#allocation10 + $0xb0] sm:$0xff]  ;;  %v825_v35 = vld [vmem:[#allocation10 + $0xa8] sm:$0xff]  ;;  %v213_v49 = vmul.u32 512, %v205_v47  ;;  %v210_v50 = vadd.s32 128, %v209_v48  ;;  %v211_v54 = vadd.s32 256, %v209_v48 }
  0x1d   :  { %153 = vmatpush.bf16.msra.mxu0 %v619_v20  ;;  %166 = vmatpush.bf16.msra.mxu1 %v623_v24  ;;  %v835_v29 = vld [vmem:[#allocation10 + $0xf8] sm:$0xff]  ;;  %v834_v33 = vld [vmem:[#allocation10 + $0xf0] sm:$0xff]  ;;  %v808_v36 = vld [vmem:[#allocation10 + $0x20] sm:$0xff]  ;;  %v219_v52 = vstv %s218_s19  ;;  %v212_v55 = vadd.s32 384, %v209_v48  ;;  %s602_s22 = sshll.u32 %s982_s21, 4  ;;  %s604_s25 = sshll.u32 %s1059_s6, 4  ;;  %s603_s22 = int_to_ptr.vmem [resolvable:$true] %s602_s22  ;;  %s605_s25 = int_to_ptr.hbm [resolvable:$true] %s604_s25 }
  0x1e   :  { %650 = vmatmul.msk.bf16.vlgmr.msra.gmra.mxu2 %vm142_vm0, %v83_v26  ;;  %v833_v37 = vld [vmem:[#allocation10 + $0xe8] sm:$0xff]  ;;  %v816_v38 = vld [vmem:[#allocation10 + $0x60] sm:$0xff]  ;;  %v807_v40 = vld [vmem:[#allocation10 + $0x18] sm:$0xff]  ;;  %v214_v51 = vadd.s32 %v213_v49, %v209_v48  ;;  %v215_v53 = vadd.s32 %v213_v49, %v210_v50  ;;  %v216_v58 = vadd.s32 %v213_v49, %v211_v54 }
  0x1f   :  { %651 = vmatmul.msk.bf16.vlgmr.msra.gmra.mxu3 %vm142_vm0, %v83_v26  ;;  %570 = vmatpush.bf16.msrb.mxu2 %v827_v27  ;;  %v824_v39 = vld [vmem:[#allocation10 + $0xa0] sm:$0xff]  ;;  %v815_v42 = vld [vmem:[#allocation10 + $0x58] sm:$0xff]  ;;  %v806_v44 = vld [vmem:[#allocation10 + $0x10] sm:$0xff]  ;;  %v217_v59 = vadd.s32 %v213_v49, %v212_v55 }
  0x20   :  { %648 = vmatmul.msk.bf16.vlgmr.msra.gmra.mxu0 %vm142_vm0, %v83_v26  ;;  %649 = vmatmul.msk.bf16.vlgmr.msra.gmra.mxu1 %vm142_vm0, %v83_v26  ;;  %v832_v41 = vld [vmem:[#allocation10 + $0xe0] sm:$0xff]  ;;  %v823_v43 = vld [vmem:[#allocation10 + $0x98] sm:$0xff]  ;;  %v220_v56 = vxor.u32 %v219_v52, %v214_v51  ;;  %v221_v57 = vxor.u32 %v219_v52, %v215_v53  ;;  %v222_v62 = vxor.u32 %v219_v52, %v216_v58  ;;  %v814_v1 = vld [vmem:[#allocation10 + $0x50] sm:$0xff] }
  0x21   :  { %544 = vmatpush.bf16.msrb.mxu0 %v811_v23  ;;  %557 = vmatpush.bf16.msrb.mxu1 %v819_v25  ;;  %v831_v45 = vld [vmem:[#allocation10 + $0xd8] sm:$0xff]  ;;  %v223_v63 = vxor.u32 %v219_v52, %v217_v59  ;;  %v805_v5 = vld [vmem:[#allocation10 + $0x8] sm:$0xff]  ;;  %v822_v6 = vld [vmem:[#allocation10 + $0x90] sm:$0xff] }
  0x22   :  { %583 = vmatpush.bf16.msrb.mxu3 %v835_v29  ;;  %v224_v60 = vxor.u32 608135816, %v220_v56  ;;  %v225_v61 = vxor.u32 608135816, %v221_v57  ;;  %v226_v3 = vxor.u32 608135816, %v222_v62 }
  0x23   :  { %571 = vmatpush.bf16.msrb.mxu2 %v826_v31  ;;  %v227_v4 = vxor.u32 608135816, %v223_v63  ;;  %v830_v7 = vld [vmem:[#allocation10 + $0xd0] sm:$0xff]  ;;  %v813_v9 = vld [vmem:[#allocation10 + $0x48] sm:$0xff]  ;;  %v804_v13 = vld [vmem:[#allocation10] sm:$0xff] }
  0x24   :  { %v228_v0 = vshrl.u32 %v224_v60, 16  ;;  %v229_v2 = vshrl.u32 %v225_v61, 16  ;;  %v230_v11 = vshrl.u32 %v226_v3, 16  ;;  %v821_v14 = vld [vmem:[#allocation10 + $0x88] sm:$0xff]  ;;  %v812_v17 = vld [vmem:[#allocation10 + $0x40] sm:$0xff] }
  0x25   :  { %545 = vmatpush.bf16.msrb.mxu0 %v810_v28  ;;  %558 = vmatpush.bf16.msrb.mxu1 %v818_v30  ;;  %v231_v12 = vshrl.u32 %v227_v4, 16  ;;  %v829_v15 = vld [vmem:[#allocation10 + $0xc8] sm:$0xff]  ;;  %v820_v21 = vld [vmem:[#allocation10 + $0x80] sm:$0xff] }
  0x26   :  { %584 = vmatpush.bf16.msrb.mxu3 %v834_v33  ;;  %v232_v8 = vxor.u32 %v228_v0, %v224_v60  ;;  %v233_v10 = vxor.u32 %v229_v2, %v225_v61  ;;  %v234_v19 = vxor.u32 %v230_v11, %v226_v3  ;;  %v828_v22 = vld [vmem:[#allocation10 + $0xc0] sm:$0xff] }
  0x27   :  { %572 = vmatpush.bf16.msrb.mxu2 %v825_v35  ;;  %v235_v20 = vxor.u32 %v231_v12, %v227_v4 }
  0x28   :  { %v236_v16 = vmul.u32 2246822507, %v232_v8  ;;  %v237_v18 = vmul.u32 2246822507, %v233_v10  ;;  %v238_v25 = vmul.u32 2246822507, %v234_v19 }
  0x29   :  { %546 = vmatpush.bf16.msrb.mxu0 %v809_v32  ;;  %559 = vmatpush.bf16.msrb.mxu1 %v817_v34  ;;  %v239_v26 = vmul.u32 2246822507, %v235_v20 }
  0x2a   :  { %585 = vmatpush.bf16.msrb.mxu3 %v833_v37  ;;  %v240_v23 = vshrl.u32 %v236_v16, 13  ;;  %v241_v24 = vshrl.u32 %v237_v18, 13  ;;  %v242_v29 = vshrl.u32 %v238_v25, 13 }
  0x2b   :  { %573 = vmatpush.bf16.msrb.mxu2 %v824_v39  ;;  %v243_v30 = vshrl.u32 %v239_v26, 13  ;;  %v92_v39 = vld [vmem:[#allocation9] sm:$0xf] }
  0x2c   :  { %v244_v27 = vxor.u32 %v240_v23, %v236_v16  ;;  %v245_v28 = vxor.u32 %v241_v24, %v237_v18  ;;  %v246_v33 = vxor.u32 %v242_v29, %v238_v25  ;;  %v96_v54 = vperm.slane %v92_v39, 2  ;;  %v845_v16 = vld [vmem:[%s1058_s5] ss:$0 sm:$0xff] }
  0x2d   :  { %547 = vmatpush.bf16.msrb.mxu0 %v808_v36  ;;  %560 = vmatpush.bf16.msrb.mxu1 %v816_v38  ;;  %v247_v34 = vxor.u32 %v243_v30, %v239_v26  ;;  %v97_v56 = vperm.slane %v92_v39, 3 }
  0x2e   :  { %586 = vmatpush.bf16.msrb.mxu3 %v832_v41  ;;  %v248_v31 = vmul.u32 3266489909, %v244_v27  ;;  %v249_v32 = vmul.u32 3266489909, %v245_v28  ;;  %v250_v37 = vmul.u32 3266489909, %v246_v33 }
  0x2f   :  { %574 = vmatpush.bf16.msrb.mxu2 %v823_v43  ;;  %v251_v38 = vmul.u32 3266489909, %v247_v34  ;;  %v94_v43 = vperm.slane %v92_v39, 0 }
  0x30   :  { %v252_v35 = vshrl.u32 %v248_v31, 16  ;;  %v253_v36 = vshrl.u32 %v249_v32, 16 }
  0x31   :  { %548 = vmatpush.bf16.msrb.mxu0 %v807_v40  ;;  %561 = vmatpush.bf16.msrb.mxu1 %v815_v42  ;;  %v254_v42 = vshrl.u32 %v250_v37, 16 }
  0x32   :  { %587 = vmatpush.bf16.msrb.mxu3 %v831_v45  ;;  %v256_v40 = vxor.u32 %v252_v35, %v248_v31  ;;  %v257_v41 = vxor.u32 %v253_v36, %v249_v32  ;;  %v95_v45 = vperm.slane %v92_v39, 1 }
  0x33   :  { %575 = vmatpush.bf16.msrb.mxu2 %v822_v6  ;;  %v258_v49 = vxor.u32 %v254_v42, %v250_v37 }
  0x34   :  { %v652_v46 = vxor.u32 2147483648, %v256_v40  ;;  %v653_v48 = vxor.u32 2147483648, %v257_v41 }
  0x35   :  { %549 = vmatpush.bf16.msrb.mxu0 %v806_v44  ;;  %562 = vmatpush.bf16.msrb.mxu1 %v814_v1  ;;  %v255_v44 = vshrl.u32 %v251_v38, 16  ;;  %v654_v60 = vxor.u32 2147483648, %v258_v49 }
  0x36   :  { %588 = vmatpush.bf16.msrb.mxu3 %v830_v7  ;;  %vm1033_vm1 = vcmp.ge.s32.totalorder %v652_v46, 0  ;;  %vm1037_vm2 = vcmp.ge.s32.totalorder %v653_v48, 0 }
  0x37   :  { %576 = vmatpush.bf16.msrb.mxu2 %v821_v14  ;;  %v259_v52 = vxor.u32 %v255_v44, %v251_v38  ;;  %vm784_vm3 = vmpackc.low %vm1033_vm1, %vm1033_vm1  ;;  %vm268_vm5 = vcmp.ge.s32.totalorder %v654_v60, 0 }
  0x38   :  { %vm787_vm4 = vmpackc.low %vm1037_vm2, %vm1037_vm2 }
  0x39   :  { %550 = vmatpush.bf16.msrb.mxu0 %v805_v5  ;;  %563 = vmatpush.bf16.msrb.mxu1 %v813_v9  ;;  %v655_v63 = vxor.u32 2147483648, %v259_v52  ;;  %vm790_vm7 = vmpackc.low %vm268_vm5, %vm268_vm5 }
  0x3a   :  { %589 = vmatpush.bf16.msrb.mxu3 %v829_v15 }
  0x3b   :  { %577 = vmatpush.bf16.msrb.mxu2 %v820_v21  ;;  %vm271_vm6 = vcmp.ge.s32.totalorder %v655_v63, 0 }
  0x3c   :  { %vm793_vm8 = vmpackc.low %vm271_vm6, %vm271_vm6 }
  0x3d   :  { %551 = vmatpush.bf16.msrb.mxu0 %v804_v13  ;;  %564 = vmatpush.bf16.msrb.mxu1 %v812_v17 }
  0x3e   :  { %590 = vmatpush.bf16.msrb.mxu3 %v828_v22 }
  0x9d   :  { %v155_v47 = vpop.f32.mrf.mxu0  ;;  %v168_v51 = vpop.f32.mrf.mxu1 }
  0x9e   :  { %v156_v50 = vadd.f32 %v155_v47, %v94_v43  ;;  %v169_v53 = vadd.f32 %v168_v51, %v95_v45 }
  0xa0   :  { %v198_v55 = vmax.f32 %v156_v50, 0.0  ;;  %v199_v58 = vmax.f32 %v169_v53, 0.0 }
  0xa1   :  { %v181_v62 = vpop.f32.mrf.mxu2 }
  0xa2   :  { %v272_v61 = vmul.f32 2.0, %v198_v55  ;;  %v273_v0 = vmul.f32 2.0, %v199_v58  ;;  %v182_v1 = vadd.f32 %v181_v62, %v96_v54  ;;  %v194_v2 = vpop.f32.mrf.mxu3 }
  0xa3   :  { %v195_v4 = vadd.f32 %v194_v2, %v97_v56 }
  0xa4   :  { %v785_v3 = vpack.c.bf16 %v272_v61, %v272_v61  ;;  %v788_v5 = vpack.c.bf16 %v273_v0, %v273_v0  ;;  %v200_v6 = vmax.f32 %v182_v1, 0.0 }
  0xa5   :  { %v157_v7 = vpop.f32.mrf.mxu0  ;;  %v201_v8 = vmax.f32 %v195_v4, 0.0  ;;  %v170_v9 = vpop.f32.mrf.mxu1 }
  0xa6   :  { %786 = vmatmul.msk.bf16.vlgmr.msrb.gmra.mxu0 %vm784_vm3, %v785_v3  ;;  %v274_v10 = vmul.f32 2.0, %v200_v6  ;;  %789 = vmatmul.msk.bf16.vlgmr.msrb.gmra.mxu1 %vm787_vm4, %v788_v5 }
  0xa7   :  { %v275_v11 = vmul.f32 2.0, %v201_v8 }
  0xa8   :  { %v791_v12 = vpack.c.bf16 %v274_v10, %v274_v10 }
  0xa9   :  { %v794_v13 = vpack.c.bf16 %v275_v11, %v275_v11  ;;  %v183_v14 = vpop.f32.mrf.mxu2 }
  0xaa   :  { %v196_v15 = vpop.f32.mrf.mxu3  ;;  %792 = vmatmul.msk.bf16.vlgmr.msrb.gmra.mxu2 %vm790_vm7, %v791_v12 }
  0xab   :  { %795 = vmatmul.msk.bf16.vlgmr.msrb.gmra.mxu3 %vm793_vm8, %v794_v13 }
 0x123   :  { %v553_v17 = vpop.f32.mrf.mxu0  ;;  %v566_v18 = vpop.f32.mrf.mxu1 }
 0x124   :  { %v554_v19 = vadd.f32 %v845_v16, %v553_v17 }
 0x126   :  { %v567_v20 = vadd.f32 %v566_v18, %v554_v19 }
 0x12b   :  { %v555_v21 = vpop.f32.mrf.mxu0  ;;  %v568_v22 = vpop.f32.mrf.mxu1 }
 0x12d   :  { %v579_v23 = vpop.f32.mrf.mxu2 }
 0x12e   :  { %v580_v24 = vadd.f32 %v579_v23, %v567_v20  ;;  %v592_v25 = vpop.f32.mrf.mxu3 }
 0x130   :  { %v593_v26 = vadd.f32 %v592_v25, %v580_v24 }
 0x132   :  { %596 = vst [vmem:[#allocation12] sm:$0xff] %v593_v26 }
 0x133   :  { %607 = dma.vmem_to_hbm [thread:$0]  %s603_s22, 128, %s605_s25, [#allocation6]  }
 0x135   :  { %v581_v27 = vpop.f32.mrf.mxu2 }
 0x136   :  { %v594_v28 = vpop.f32.mrf.mxu3 }
 0x137   :  { %972 = dma.done.wait [#allocation6], 128  }
 0x138   :  { %973 = vsyncadd [#allocation6], 4294967168 }
 0x139   :  { %612 = vsyncpa [#allocation5], 1 }
 0x13a   :  { %613 = vsyncpa [#allocation8], 1 }
 0x13b   :  { %614 = vsyncpa [#allocation11], 1 }
 0x13c   :  { %615 = vsyncpa [#allocation6], 1 }

</bundles_post_ra>
